<compile_context>
chip_gen: v6e
topology: v6e:2x2x1
jax: 0.10.0
libtpu: 0.0.40
codegen_flags: <defaults>
</compile_context>

<pallas_src>
import functools
import math

import jax
import jax.numpy as jnp
import numpy as np
from jax import lax
from jax.experimental import pallas as pl
from jax.experimental.pallas import tpu as pltpu

_MXU_DTYPE = jnp.bfloat16   # forced MXU operand dtype (fast path on v5e/v6e/v7x)


# ----------------------------------------------------------------------------
# Per-generation tiling config
# ----------------------------------------------------------------------------
def _device_kind():
    try:
        return jax.devices()[0].device_kind.lower()
    except Exception:
        return ""


def _fit_block(dim, target, align):
    """Largest divisor of `dim` that is <= target and a multiple of `align`.
    Falls back to the full dimension (always a legal block size)."""
    if dim <= target:
        return dim
    cand = (target // align) * align
    while cand >= align:
        if dim % cand == 0:
            return cand
        cand -= align
    return dim


def _attn_config(n, rep):
    """(block_q, block_kv, vmem_limit_bytes) for the flash kernels."""
    kind = _device_kind()
    if "v7" in kind:        # 64 MiB VMEM / TC, ~3.2 TB/s HBM shared by 2 TCs
        rows_t, bkv_t, vmem = 1024, 1024, 48 * 2**20
    elif "v6" in kind:      # 128 MiB VMEM, crossover ~685 rows -> go big
        rows_t, bkv_t, vmem = 1024, 1024, 96 * 2**20
    elif "v5" in kind:      # lowest compute:BW ratio
        rows_t, bkv_t, vmem = 512, 1024, 64 * 2**20
    else:
        rows_t, bkv_t, vmem = 512, 1024, None
    # 16-row alignment: bf16 native sublane tile is (16, 128).
    block_q = _fit_block(n, max(16, rows_t // max(rep, 1)), 16)
    block_kv = _fit_block(n, bkv_t, 16)
    return block_q, block_kv, vmem


def _ensure_two_parallel_steps(block_q, batch, groups, n):
    """v7x has 2 TensorCores: keep >= 2 parallel grid steps if possible."""
    if "v7" in _device_kind():
        while batch * groups * (n // block_q) < 2 and block_q % 32 == 0:
            block_q //= 2
    return block_q


def _linear_config():
    """(tm_target, tn_target, tk_target, vmem_limit_bytes) for pallas_linear."""
    kind = _device_kind()
    if "v7" in kind:
        return 512, 512, 512, 48 * 2**20
    if "v6" in kind:
        return 1024, 1024, 1024, 96 * 2**20
    if "v5" in kind:
        return 512, 512, 512, 64 * 2**20
    return 512, 512, 512, None


def _compiler_params(dimension_semantics, vmem_limit_bytes):
    kwargs = dict(dimension_semantics=dimension_semantics)
    if vmem_limit_bytes is not None:
        kwargs["vmem_limit_bytes"] = vmem_limit_bytes
    return pltpu.CompilerParams(**kwargs)


# ----------------------------------------------------------------------------
# Tiled linear projection: y = x @ w + b
# ----------------------------------------------------------------------------
def _linear_kernel(x_ref, w_ref, b_ref, o_ref, acc_ref):
    k_idx = pl.program_id(2)

    @pl.when(k_idx == 0)
    def _():
        acc_ref[...] = jnp.zeros_like(acc_ref)

    # bf16 MXU operands (f32 inputs would otherwise take the slow fp32 path;
    # v7x has no fp32 MXU at all).  Accumulation stays fp32.
    acc_ref[...] += jnp.dot(x_ref[...].astype(_MXU_DTYPE),
                            w_ref[...].astype(_MXU_DTYPE),
                            preferred_element_type=jnp.float32)

    @pl.when(k_idx == pl.num_programs(2) - 1)
    def _():
        o_ref[...] = (acc_ref[...] + b_ref[...].astype(jnp.float32)).astype(o_ref.dtype)


def pallas_linear(x2d, w, b, *, tm=None, tn=None, tk=None):
    """y = x2d @ w + b   (equivalent to torch nn.Linear with weight = w.T)."""
    m, fin = x2d.shape
    fout = w.shape[1]

    tm_t, tn_t, tk_t, vmem = _linear_config()
    tm = _fit_block(m, tm_t, 16) if tm is None else tm
    tn = _fit_block(fout, tn_t, 128) if tn is None else tn
    tk = _fit_block(fin, tk_t, 128) if tk is None else tk
    assert m % tm == 0 and fout % tn == 0 and fin % tk == 0

    grid_spec = pltpu.PrefetchScalarGridSpec(
        num_scalar_prefetch=0,
        grid=(m // tm, fout // tn, fin // tk),
        in_specs=[
            pl.BlockSpec((tm, tk), lambda i, j, k: (i, k)),
            pl.BlockSpec((tk, tn), lambda i, j, k: (k, j)),
            pl.BlockSpec((1, tn), lambda i, j, k: (0, j)),
        ],
        out_specs=pl.BlockSpec((tm, tn), lambda i, j, k: (i, j)),
        scratch_shapes=[pltpu.VMEM((tm, tn), jnp.float32)],
    )

    return pl.pallas_call(
        _linear_kernel,
        out_shape=jax.ShapeDtypeStruct((m, fout), x2d.dtype),
        grid_spec=grid_spec,
        compiler_params=_compiler_params(("parallel", "parallel", "arbitrary"), vmem),
    )(x2d, w, b.reshape(1, fout))


# ----------------------------------------------------------------------------
# GQA flash attention — shared online-softmax step (exp2 domain)
# ----------------------------------------------------------------------------
def _online_softmax_step(s, v_bf16, m_sc, l_sc, acc_sc):
    """One KV-block update.  `s` already includes softmax_scale*log2(e)."""
    m_prev = m_sc[...]                              # (rows, 128) lane-replicated
    l_prev = l_sc[...]
    m_new = jnp.maximum(m_prev, jnp.max(s, axis=-1, keepdims=True))
    alpha = jnp.exp2(m_prev - m_new)                # EUP-native
    p = jnp.exp2(s - m_new[:, :1])
    l_sc[...] = alpha * l_prev + jnp.sum(p, axis=-1, keepdims=True)
    acc_sc[...] = alpha[:, :1] * acc_sc[...] + jnp.dot(
        p.astype(_MXU_DTYPE), v_bf16, preferred_element_type=jnp.float32)
    m_sc[...] = m_new


# ---- Path B kernel: head-major 4D layout (fallback for head_dim % 128 != 0) --
def _flash_kernel(q_ref, k_ref, v_ref, o_ref, m_sc, l_sc, acc_sc, *, rep):
    kv_idx = pl.program_id(3)

    @pl.when(kv_idx == 0)
    def _():
        m_sc[...] = jnp.full_like(m_sc, -jnp.inf)
        l_sc[...] = jnp.zeros_like(l_sc)
        acc_sc[...] = jnp.zeros_like(acc_sc)

    bq, dh = q_ref.shape[2], q_ref.shape[3]
    rows = rep * bq

    # All `rep` heads of this KV group share the streamed K/V tile.
    # Q already carries softmax_scale*log2(e) (folded into wq by the wrapper).
    q = q_ref[0].reshape(rows, dh).astype(_MXU_DTYPE)
    k = k_ref[0, 0].astype(_MXU_DTYPE)              # (block_kv, Dh)
    v = v_ref[0, 0].astype(_MXU_DTYPE)              # (block_kv, Dh)

    s = lax.dot_general(q, k, (((1,), (1,)), ((), ())),
                        preferred_element_type=jnp.float32)   # (rows, block_kv)
    _online_softmax_step(s, v, m_sc, l_sc, acc_sc)

    @pl.when(kv_idx == pl.num_programs(3) - 1)
    def _():
        inv_l = pl.reciprocal(l_sc[...][:, :1], approx=True)   # EUP, epilogue only
        out = (acc_sc[...] * inv_l).astype(o_ref.dtype)
        o_ref[...] = out.reshape(1, rep, bq, dh)


def pallas_gqa_flash_attention(q, k, v, *, block_q=None, block_kv=None,
                               vmem_limit_bytes=None):
    """q: (B, H, N, Dh), k/v: (B, G, N, Dh) -> (B, H, N, Dh).
    Non-causal; Q is expected pre-scaled by softmax_scale*log2(e)."""
    B, H, N, Dh = q.shape
    G = k.shape[1]
    assert H % G == 0, "num_heads must be a multiple of num_groups"
    rep = H // G

    cfg_bq, cfg_bkv, cfg_vmem = _attn_config(N, rep)
    auto_bq = block_q is None
    block_q = cfg_bq if block_q is None else block_q
    block_kv = cfg_bkv if block_kv is None else block_kv
    vmem_limit_bytes = cfg_vmem if vmem_limit_bytes is None else vmem_limit_bytes
    if auto_bq:
        block_q = _ensure_two_parallel_steps(block_q, B, G, N)
    assert N % block_q == 0 and N % block_kv == 0

    nq, nkv = N // block_q, N // block_kv
    rows = rep * block_q
    kernel = functools.partial(_flash_kernel, rep=rep)

    grid_spec = pltpu.PrefetchScalarGridSpec(
        num_scalar_prefetch=0,
        grid=(B, G, nq, nkv),
        in_specs=[
            pl.BlockSpec((1, rep, block_q, Dh), lambda b, g, qi, kv: (b, g, qi, 0)),
            pl.BlockSpec((1, 1, block_kv, Dh), lambda b, g, qi, kv: (b, g, kv, 0)),
            pl.BlockSpec((1, 1, block_kv, Dh), lambda b, g, qi, kv: (b, g, kv, 0)),
        ],
        out_specs=pl.BlockSpec((1, rep, block_q, Dh),
                               lambda b, g, qi, kv: (b, g, qi, 0)),
        scratch_shapes=[
            pltpu.VMEM((rows, 128), jnp.float32),   # running max (lane-dense)
            pltpu.VMEM((rows, 128), jnp.float32),   # running denom (lane-dense)
            pltpu.VMEM((rows, Dh), jnp.float32),    # fp32 output accumulator
        ],
    )

    return pl.pallas_call(
        kernel,
        out_shape=jax.ShapeDtypeStruct((B, H, N, Dh), q.dtype),
        grid_spec=grid_spec,
        compiler_params=_compiler_params(
            ("parallel", "parallel", "parallel", "arbitrary"), vmem_limit_bytes),
    )(q, k, v)


# ---- Path A kernel: lane-sliced (B*N, E) slab, no head transposes ----------
def _flash_slab_kernel(q_ref, k_ref, v_ref, o_ref, m_sc, l_sc, acc_sc,
                       *, rep, head_dim):
    kv_idx = pl.program_id(3)

    @pl.when(kv_idx == 0)
    def _():
        m_sc[...] = jnp.full_like(m_sc, -jnp.inf)
        l_sc[...] = jnp.zeros_like(l_sc)
        acc_sc[...] = jnp.zeros_like(acc_sc)

    bq = q_ref.shape[0]
    k = k_ref[...].astype(_MXU_DTYPE)               # (block_kv, Dh)
    v = v_ref[...].astype(_MXU_DTYPE)               # (block_kv, Dh)

    # Per-head QK^T (static loop over `rep`); heads share the streamed K tile.
    s_parts = []
    for h in range(rep):
        qh = q_ref[:, h * head_dim:(h + 1) * head_dim].astype(_MXU_DTYPE)
        s_parts.append(lax.dot_general(qh, k, (((1,), (1,)), ((), ())),
                                       preferred_element_type=jnp.float32))
    s = jnp.concatenate(s_parts, axis=0) if rep > 1 else s_parts[0]  # (rows, bkv)

    _online_softmax_step(s, v, m_sc, l_sc, acc_sc)

    @pl.when(kv_idx == pl.num_programs(3) - 1)
    def _():
        inv_l = pl.reciprocal(l_sc[...][:, :1], approx=True)
        out = acc_sc[...] * inv_l                    # (rows, Dh) fp32
        for h in range(rep):                         # lane-aligned slab writeback
            o_ref[:, h * head_dim:(h + 1) * head_dim] = (
                out[h * bq:(h + 1) * bq, :].astype(o_ref.dtype))


def pallas_gqa_flash_attention_slab(q2d, k2d, v2d, *, batch, seq, num_heads,
                                    num_groups, head_dim, k_col_base=0,
                                    v_col_base=0, block_q=None, block_kv=None,
                                    vmem_limit_bytes=None):
    """Attention over lane-dense 2D slabs.
    q2d rows = batch*seq; group g's heads occupy columns [g*rep*Dh, (g+1)*rep*Dh).
    k2d/v2d group g occupies Dh columns starting at (k_col_base+g)*Dh /
    (v_col_base+g)*Dh (lets the fused [q|k|v] slab be passed for all three).
    Q is expected pre-scaled by softmax_scale*log2(e).  Requires Dh % 128 == 0."""
    assert head_dim % 128 == 0
    rep = num_heads // num_groups
    embed = num_heads * head_dim
    N = seq
    assert q2d.shape[0] == batch * seq

    cfg_bq, cfg_bkv, cfg_vmem = _attn_config(N, rep)
    auto_bq = block_q is None
    block_q = cfg_bq if block_q is None else block_q
    block_kv = cfg_bkv if block_kv is None else block_kv
    vmem_limit_bytes = cfg_vmem if vmem_limit_bytes is None else vmem_limit_bytes
    if auto_bq:
        block_q = _ensure_two_parallel_steps(block_q, batch, num_groups, N)
    assert N % block_q == 0 and N % block_kv == 0

    nq, nkv = N // block_q, N // block_kv
    rows = rep * block_q
    kernel = functools.partial(_flash_slab_kernel, rep=rep, head_dim=head_dim)

    grid_spec = pltpu.PrefetchScalarGridSpec(
        num_scalar_prefetch=0,
        grid=(batch, num_groups, nq, nkv),
        in_specs=[
            pl.BlockSpec((block_q, rep * head_dim),
                         lambda b, g, qi, kv: (b * nq + qi, g)),
            pl.BlockSpec((block_kv, head_dim),
                         lambda b, g, qi, kv: (b * nkv + kv, k_col_base + g)),
            pl.BlockSpec((block_kv, head_dim),
                         lambda b, g, qi, kv: (b * nkv + kv, v_col_base + g)),
        ],
        out_specs=pl.BlockSpec((block_q, rep * head_dim),
                               lambda b, g, qi, kv: (b * nq + qi, g)),
        scratch_shapes=[
            pltpu.VMEM((rows, 128), jnp.float32),
            pltpu.VMEM((rows, 128), jnp.float32),
            pltpu.VMEM((rows, head_dim), jnp.float32),
        ],
    )

    return pl.pallas_call(
        kernel,
        out_shape=jax.ShapeDtypeStruct((batch * seq, embed), q2d.dtype),
        grid_spec=grid_spec,
        compiler_params=_compiler_params(
            ("parallel", "parallel", "parallel", "arbitrary"), vmem_limit_bytes),
    )(q2d, k2d, v2d)


# ----------------------------------------------------------------------------
# Module wrapper (parameter setup + glue)
# ----------------------------------------------------------------------------
def init_params(key, embed_size, num_heads, num_groups):
    kv_dim = embed_size // (num_heads // num_groups)
    keys = jax.random.split(key, 8)

    def lin(kw, kb, fin, fout):
        w = 0.02 * jax.random.normal(kw, (fin, fout), jnp.float32)
        b = 0.01 * jax.random.normal(kb, (fout,), jnp.float32)
        return w, b

    wq, bq = lin(keys[0], keys[1], embed_size, embed_size)
    wk, bk = lin(keys[2], keys[3], embed_size, kv_dim)
    wv, bv = lin(keys[4], keys[5], embed_size, kv_dim)
    wo, bo = lin(keys[6], keys[7], embed_size, embed_size)
    return dict(wq=wq, bq=bq, wk=wk, bk=bk, wv=wv, bv=bv, wo=wo, bo=bo)


def flash_attention_forward(params, q, k, v, *, num_heads, num_groups,
                            compute_dtype=None,
                            attn_block_q=None, attn_block_kv=None):
    b, n, embed = q.shape
    assert embed % num_heads == 0 and num_heads % num_groups == 0
    head_dim = embed // num_heads
    dt = q.dtype if compute_dtype is None else jnp.dtype(compute_dtype)

    # Fold softmax_scale (1/sqrt(Dh)) AND log2(e) (exp -> exp2 domain) into the
    # Q projection weights: zero per-KV-step scaling work inside the kernels.
    qscale = jnp.asarray(math.log2(math.e) / math.sqrt(head_dim),
                         params["wq"].dtype)
    wq = (params["wq"] * qscale).astype(dt)
    bq_ = (params["bq"] * qscale).astype(dt)
    wk, bk_ = params["wk"].astype(dt), params["bk"].astype(dt)
    wv, bv_ = params["wv"].astype(dt), params["bv"].astype(dt)
    wo, bo_ = params["wo"].astype(dt), params["bo"].astype(dt)

    if head_dim % 128 == 0:
        # Lane-sliced slab path: attention consumes / produces the lane-dense
        # (B*N, E) projection slabs directly -> no head-layout transposes.
        if q is k and k is v:
            # Self-attention: fused [wq|wk|wv] projection, x read from HBM once,
            # and the fused slab is fed straight to the attention BlockSpecs.
            x2d = q.astype(dt).reshape(b * n, embed)
            w_qkv = jnp.concatenate([wq, wk, wv], axis=1)
            b_qkv = jnp.concatenate([bq_, bk_, bv_])
            qkv2d = pallas_linear(x2d, w_qkv, b_qkv)
            attn2d = pallas_gqa_flash_attention_slab(
                qkv2d, qkv2d, qkv2d, batch=b, seq=n,
                num_heads=num_heads, num_groups=num_groups, head_dim=head_dim,
                k_col_base=num_heads, v_col_base=num_heads + num_groups,
                block_q=attn_block_q, block_kv=attn_block_kv)
        else:
            q2d = pallas_linear(q.astype(dt).reshape(b * n, embed), wq, bq_)
            k2d = pallas_linear(k.astype(dt).reshape(b * n, embed), wk, bk_)
            v2d = pallas_linear(v.astype(dt).reshape(b * n, embed), wv, bv_)
            attn2d = pallas_gqa_flash_attention_slab(
                q2d, k2d, v2d, batch=b, seq=n,
                num_heads=num_heads, num_groups=num_groups, head_dim=head_dim,
                block_q=attn_block_q, block_kv=attn_block_kv)
    else:
        # Fallback for head_dim not lane-aligned: head-major 4D layout.
        # TODO(synk): extend the QKV projection fusion to this path as well.
        q2d = pallas_linear(q.astype(dt).reshape(b * n, embed), wq, bq_)
        k2d = pallas_linear(k.astype(dt).reshape(b * n, embed), wk, bk_)
        v2d = pallas_linear(v.astype(dt).reshape(b * n, embed), wv, bv_)
        qh = q2d.reshape(b, n, num_heads, head_dim).transpose(0, 2, 1, 3)
        kg = k2d.reshape(b, n, num_groups, head_dim).transpose(0, 2, 1, 3)
        vg = v2d.reshape(b, n, num_groups, head_dim).transpose(0, 2, 1, 3)
        attn = pallas_gqa_flash_attention(qh, kg, vg,
                                          block_q=attn_block_q,
                                          block_kv=attn_block_kv)
        attn2d = attn.transpose(0, 2, 1, 3).reshape(b * n, embed)

    out = pallas_linear(attn2d, wo, bo_).reshape(b, n, embed)
    return out, None


# ----------------------------------------------------------------------------
# Pure-JAX reference (for verification only)
# ----------------------------------------------------------------------------
def reference_forward(params, q, k, v, *, num_heads, num_groups):
    b, n, embed = q.shape
    head_dim = embed // num_heads
    rep = num_heads // num_groups

    qp = (q.reshape(b * n, embed) @ params["wq"] + params["bq"]).reshape(
        b, n, num_heads, head_dim)
    kp = (k.reshape(b * n, embed) @ params["wk"] + params["bk"]).reshape(
        b, n, num_groups, head_dim)
    vp = (v.reshape(b * n, embed) @ params["wv"] + params["bv"]).reshape(
        b, n, num_groups, head_dim)

    kp = jnp.repeat(kp, rep, axis=2)
    vp = jnp.repeat(vp, rep, axis=2)

    qh = qp.transpose(0, 2, 1, 3)
    kh = kp.transpose(0, 2, 1, 3)
    vh = vp.transpose(0, 2, 1, 3)

    s = jnp.einsum("bhqd,bhkd->bhqk", qh, kh) / math.sqrt(head_dim)
    p = jax.nn.softmax(s, axis=-1)
    attn = jnp.einsum("bhqk,bhkd->bhqd", p, vh)
    attn = attn.transpose(0, 2, 1, 3).reshape(b * n, embed)
    out = (attn @ params["wo"] + params["bo"]).reshape(b, n, embed)
    return out, None


# ----------------------------------------------------------------------------
if __name__ == "__main__":
    key = jax.random.PRNGKey(0)
    kp_, kq_, kk_, kv_, kx_, kw_, kb_, kx2_ = jax.random.split(key, 8)

    # ---- Path B (head_dim = 8 < 128 -> 4D fallback kernel), small shapes ----
    embed_size, num_heads, num_groups = 32, 4, 2
    batch, seq = 2, 32
    params = init_params(kp_, embed_size, num_heads, num_groups)
    q = jax.random.normal(kq_, (batch, seq, embed_size), jnp.float32)
    k = jax.random.normal(kk_, (batch, seq, embed_size), jnp.float32)
    v = jax.random.normal(kv_, (batch, seq, embed_size), jnp.float32)

    ref, _ = reference_forward(params, q, k, v,
                               num_heads=num_heads, num_groups=num_groups)

    # 1) explicit small tiles so the online-softmax KV loop runs (nq = nkv = 4)
    out, _ = flash_attention_forward(
        params, q, k, v, num_heads=num_heads, num_groups=num_groups,
        attn_block_q=8, attn_block_kv=8)
    out = jax.block_until_ready(out)
    np.testing.assert_allclose(np.asarray(out), np.asarray(ref),
                               atol=2e-2, rtol=2e-2)

    # 2) default (auto per-generation) tile config
    out2, _ = flash_attention_forward(
        params, q, k, v, num_heads=num_heads, num_groups=num_groups)
    out2 = jax.block_until_ready(out2)
    np.testing.assert_allclose(np.asarray(out2), np.asarray(ref),
                               atol=2e-2, rtol=2e-2)

    # 3) bf16 end-to-end (fp32 softmax stats / accumulators inside the kernels)
    out_bf16, _ = flash_attention_forward(
        params, q, k, v, num_heads=num_heads, num_groups=num_groups,
        compute_dtype=jnp.bfloat16, attn_block_q=8, attn_block_kv=8)
    out_bf16 = jax.block_until_ready(out_bf16)
    np.testing.assert_allclose(np.asarray(out_bf16, dtype=np.float32),
                               np.asarray(ref), atol=6e-2, rtol=6e-2)

    # ---- Path A (head_dim = 128 -> slab kernel, fused QKV, no transposes) ----
    embed2, heads2, groups2 = 512, 4, 2          # head_dim = 128
    batch2, seq2 = 2, 256
    params2 = init_params(kw_, embed2, heads2, groups2)
    x = jax.random.normal(kx_, (batch2, seq2, embed2), jnp.float32)

    # 4) self-attention aliasing -> fused [wq|wk|wv] projection + slab kernel
    ref2, _ = reference_forward(params2, x, x, x,
                                num_heads=heads2, num_groups=groups2)
    out3, _ = flash_attention_forward(params2, x, x, x,
                                      num_heads=heads2, num_groups=groups2)
    out3 = jax.block_until_ready(out3)
    np.testing.assert_allclose(np.asarray(out3), np.asarray(ref2),
                               atol=2e-2, rtol=2e-2)

    # 5) distinct q vs k/v + explicit tiles -> multi-step KV loop in slab kernel
    q2 = jax.random.normal(kb_, (batch2, seq2, embed2), jnp.float32)
    ref3, _ = reference_forward(params2, q2, x, x,
                                num_heads=heads2, num_groups=groups2)
    out4, _ = flash_attention_forward(params2, q2, x, x,
                                      num_heads=heads2, num_groups=groups2,
                                      attn_block_q=64, attn_block_kv=64)
    out4 = jax.block_until_ready(out4)
    np.testing.assert_allclose(np.asarray(out4), np.asarray(ref3),
                               atol=2e-2, rtol=2e-2)

    # 6) standalone tiled-linear check with a multi-step reduction axis
    xt = jax.random.normal(kx2_, (64, 256), jnp.float32)
    wt = 0.02 * jax.random.normal(kw_, (256, 384), jnp.float32)
    bt = 0.02 * jax.random.normal(kb_, (384,), jnp.float32)
    yt = jax.block_until_ready(pallas_linear(xt, wt, bt, tm=32, tn=128, tk=128))
    yt_ref = jnp.dot(xt, wt, precision=lax.Precision.HIGHEST) + bt
    np.testing.assert_allclose(np.asarray(yt), np.asarray(yt_ref),
                               atol=2e-2, rtol=2e-2)

    print("KERNEL_OK")
</pallas_src>

<mosaic_0001>
module attributes {stable_mosaic.version = 11 : i64} {
  func.func @_linear_kernel(%arg0: i32, %arg1: i32, %arg2: i32, %arg3: memref<64x32xf32, #tpu.memory_space<vmem>>, %arg4: memref<32x32xf32, #tpu.memory_space<vmem>>, %arg5: memref<1x32xf32, #tpu.memory_space<vmem>>, %arg6: memref<64x32xf32, #tpu.memory_space<vmem>>, %arg7: memref<64x32xf32, #tpu.memory_space<vmem>>) attributes {dimension_semantics = [#tpu.dimension_semantics<parallel>, #tpu.dimension_semantics<parallel>, #tpu.dimension_semantics<arbitrary>], iteration_bounds = array<i64: 1, 1, 1>, scalar_prefetch = 0 : i64, scratch_operands = 1 : i64, tpu.core_type = #tpu.core_type<tc>, window_params = [{transform_indices = @transform_0, window_bounds = array<i64: 64, 32>}, {transform_indices = @transform_1, window_bounds = array<i64: 32, 32>}, {transform_indices = @transform_2, window_bounds = array<i64: 1, 32>}, {transform_indices = @transform_3, window_bounds = array<i64: 64, 32>}]} {
    %c0_i32 = arith.constant 0 : i32
    %0 = arith.cmpi eq, %arg2, %c0_i32 : i32
    %1 = arith.extui %0 : i1 to i32
    %c0_i32_0 = arith.constant 0 : i32
    %2 = arith.cmpi ne, %1, %c0_i32_0 : i32
    scf.if %2 {
      %cst_10 = arith.constant 0.000000e+00 : f32
      %14 = vector.broadcast %cst_10 : f32 to vector<64x32xf32>
      %c0_11 = arith.constant 0 : index
      %c0_12 = arith.constant 0 : index
      %15 = vector.load %arg7[%c0_11, %c0_12] : memref<64x32xf32, #tpu.memory_space<vmem>>, vector<64x32xf32>
      tpu.vector_store %arg7[%c0_11, %c0_12], %14 {strides = array<i32>} : memref<64x32xf32, #tpu.memory_space<vmem>>, vector<64x32xf32>,
    } else {
    }
    %c0 = arith.constant 0 : index
    %c0_1 = arith.constant 0 : index
    %3 = vector.load %arg7[%c0, %c0_1] : memref<64x32xf32, #tpu.memory_space<vmem>>, vector<64x32xf32>
    %c0_2 = arith.constant 0 : index
    %c0_3 = arith.constant 0 : index
    %4 = vector.load %arg3[%c0_2, %c0_3] : memref<64x32xf32, #tpu.memory_space<vmem>>, vector<64x32xf32>
    %5 = arith.truncf %4 : vector<64x32xf32> to vector<64x32xbf16>
    %c0_4 = arith.constant 0 : index
    %c0_5 = arith.constant 0 : index
    %6 = vector.load %arg4[%c0_4, %c0_5] : memref<32x32xf32, #tpu.memory_space<vmem>>, vector<32x32xf32>
    %7 = arith.truncf %6 : vector<32x32xf32> to vector<32x32xbf16>
    %cst = arith.constant dense<0.000000e+00> : vector<64x32xf32>
    %8 = tpu.matmul %5, %7, %cst {dimension_numbers = #tpu.dot_dimension_numbers<[1], [0], [0], [1], [0, 0, 1, 1], [], []>} : vector<64x32xbf16>, vector<32x32xbf16>, vector<64x32xf32> -> vector<64x32xf32>
    %9 = arith.addf %3, %8 : vector<64x32xf32>
    %c0_6 = arith.constant 0 : index
    %c0_7 = arith.constant 0 : index
    %10 = vector.load %arg7[%c0_6, %c0_7] : memref<64x32xf32, #tpu.memory_space<vmem>>, vector<64x32xf32>
    tpu.vector_store %arg7[%c0_6, %c0_7], %9 {strides = array<i32>} : memref<64x32xf32, #tpu.memory_space<vmem>>, vector<64x32xf32>,
    %c0_i32_8 = arith.constant 0 : i32
    %11 = arith.cmpi eq, %arg2, %c0_i32_8 : i32
    %12 = arith.extui %11 : i1 to i32
    %c0_i32_9 = arith.constant 0 : i32
    %13 = arith.cmpi ne, %12, %c0_i32_9 : i32
    scf.if %13 {
      %c0_10 = arith.constant 0 : index
      %c0_11 = arith.constant 0 : index
      %14 = vector.load %arg7[%c0_10, %c0_11] : memref<64x32xf32, #tpu.memory_space<vmem>>, vector<64x32xf32>
      %c0_12 = arith.constant 0 : index
      %c0_13 = arith.constant 0 : index
      %15 = vector.load %arg5[%c0_12, %c0_13] : memref<1x32xf32, #tpu.memory_space<vmem>>, vector<1x32xf32>
      %16 = vector.broadcast %15 : vector<1x32xf32> to vector<64x32xf32>
      %17 = arith.addf %14, %16 : vector<64x32xf32>
      %c0_14 = arith.constant 0 : index
      %c0_15 = arith.constant 0 : index
      %18 = vector.load %arg6[%c0_14, %c0_15] : memref<64x32xf32, #tpu.memory_space<vmem>>, vector<64x32xf32>
      tpu.vector_store %arg6[%c0_14, %c0_15], %17 {strides = array<i32>} : memref<64x32xf32, #tpu.memory_space<vmem>>, vector<64x32xf32>,
    } else {
    }
    return
  }
  func.func @transform_0(%arg0: i32, %arg1: i32, %arg2: i32) -> (i32, i32) {
    %c0_i32 = arith.constant 0 : i32
    return %arg0, %arg2 : i32, i32
  }
  func.func @transform_1(%arg0: i32, %arg1: i32, %arg2: i32) -> (i32, i32) {
    %c0_i32 = arith.constant 0 : i32
    return %arg2, %arg1 : i32, i32
  }
  func.func @transform_2(%arg0: i32, %arg1: i32, %arg2: i32) -> (i32, i32) {
    %c0_i32 = arith.constant 0 : i32
    %c0_i32_0 = arith.constant 0 : i32
    return %c0_i32, %arg1 : i32, i32
  }
  func.func @transform_3(%arg0: i32, %arg1: i32, %arg2: i32) -> (i32, i32) {
    %c0_i32 = arith.constant 0 : i32
    return %arg0, %arg1 : i32, i32
  }
}

</mosaic_0001>

<bundles_post_ra>
// kernel: tpu_custom_call.1
= control target key start
LH: loop header
LB: loop body
LE: loop exit
PB: predicated region body
PF: predicated region fallthrough
CT: control target
= control target key end

     0   :  { %vm19_vm0 = vcmask 261120   ;;  %v214_v3 = vmov 0.0   ;;  %s326_s1 = inlined_call_operand.vmem [shape: f32[32,32], index: 1, kind: input, shape index: {}]   ;;  %s327_s0 = inlined_call_operand.vmem [shape: f32[64,32], index: 0, kind: input, shape index: {}]   ;;  %s328_s2 = inlined_call_operand.vmem [shape: f32[1,32], index: 2, kind: input, shape index: {}]   ;;  %s329_s3 = inlined_call_operand.vmem [shape: f32[64,32], index: 3, kind: output, shape index: {}]  }
   0x1   :  { %v50_v0 = vld [vmem:[%s326_s1 + $0x10] sm:$0xff]  ;;  %v51_v1 = vld [vmem:[%s326_s1 + $0x18] sm:$0xff]  ;;  %v48_v2 = vld [vmem:[%s326_s1] sm:$0xff]  ;;  %22 = vst.msk [vmem:[#allocation2 + $0x10] sm:$0xff] %vm19_vm0, %v214_v3 }
   0x2   :  { %20 = vst.msk [vmem:[#allocation2] sm:$0xff] %vm19_vm0, %v214_v3  ;;  %21 = vst.msk [vmem:[#allocation2 + $0x8] sm:$0xff] %vm19_vm0, %v214_v3  ;;  %v53_v4 = vpack.c.bf16 %v51_v1, %v50_v0  ;;  %v49_v5 = vld [vmem:[%s326_s1 + $0x8] sm:$0xff]  ;;  %v36_v6 = vld [vmem:[%s327_s0] sm:$0xff] }
   0x3   :  { %23 = vst.msk [vmem:[#allocation2 + $0x18] sm:$0xff] %vm19_vm0, %v214_v3  ;;  %24 = vst.msk [vmem:[#allocation2 + $0x20] sm:$0xff] %vm19_vm0, %v214_v3  ;;  %v37_v7 = vld [vmem:[%s327_s0 + $0x8] sm:$0xff]  ;;  %v52_v8 = vpack.c.bf16 %v49_v5, %v48_v2  ;;  %v40_v10 = vld [vmem:[%s327_s0 + $0x20] sm:$0xff] }
   0x4   :  { %25 = vst.msk [vmem:[#allocation2 + $0x28] sm:$0xff] %vm19_vm0, %v214_v3  ;;  %26 = vst.msk [vmem:[#allocation2 + $0x30] sm:$0xff] %vm19_vm0, %v214_v3  ;;  %v44_v9 = vpack.c.bf16 %v37_v7, %v36_v6  ;;  %v41_v11 = vld [vmem:[%s327_s0 + $0x28] sm:$0xff]  ;;  %197 = vmatprep.subr.bf16.mxu0 %v53_v4  ;;  %209 = vmatprep.subr.bf16.mxu1 %v53_v4  ;;  %v38_v13 = vld [vmem:[%s327_s0 + $0x10] sm:$0xff] }
   0x5   :  { %27 = vst.msk [vmem:[#allocation2 + $0x38] sm:$0xff] %vm19_vm0, %v214_v3  ;;  %v46_v12 = vpack.c.bf16 %v41_v11, %v40_v10  ;;  %198 = vmatpush3.bf16.msra.mxu0 %v53_v4  ;;  %211 = vmatpush3.bf16.msra.mxu1 %v53_v4  ;;  %v39_v14 = vld [vmem:[%s327_s0 + $0x18] sm:$0xff]  ;;  %v42_v15 = vld [vmem:[%s327_s0 + $0x30] sm:$0xff]  ;;  %v190_v43 = vld [vmem:[%s328_s2] ss:$0 sm:$0xff] }
   0x6   :  { %v43_v16 = vld [vmem:[%s327_s0 + $0x38] sm:$0xff]  ;;  %199 = vmatprep.subr.bf16.mxu0 %v52_v8  ;;  %210 = vmatprep.subr.bf16.mxu1 %v52_v8  ;;  %v45_v17 = vpack.c.bf16 %v39_v14, %v38_v13 }
   0x7   :  { %201 = vmatprep.mubr.msk.bf16.mxu0 %vm19_vm0, %v44_v9  ;;  %205 = vmatprep.mubr.msk.bf16.mxu1 %vm19_vm0, %v46_v12  ;;  %v47_v18 = vpack.c.bf16 %v43_v16, %v42_v15 }
   0x8   :  { %v30_v19 = vld [vmem:[#allocation2 + $0x10] sm:$0xff] }
   0x9   :  { %200 = vmatpush3.bf16.msra.mxu0 %v52_v8  ;;  %212 = vmatpush3.bf16.msra.mxu1 %v52_v8  ;;  %v28_v23 = vld [vmem:[#allocation2] sm:$0xff]  ;;  %v29_v35 = vld [vmem:[#allocation2 + $0x8] sm:$0xff] }
   0xa   :  { %v32_v24 = vld [vmem:[#allocation2 + $0x20] sm:$0xff]  ;;  %v31_v29 = vld [vmem:[#allocation2 + $0x18] sm:$0xff] }
   0xb   :  { %v34_v20 = vld [vmem:[#allocation2 + $0x30] sm:$0xff]  ;;  %v33_v36 = vld [vmem:[#allocation2 + $0x28] sm:$0xff] }
   0xc   :  { %202 = vmatmul.mubr.msk.bf16.vlgmr.msra.gmra.mxu0 %vm19_vm0, %v45_v17  ;;  %206 = vmatmul.mubr.msk.bf16.vlgmr.msra.gmra.mxu1 %vm19_vm0, %v47_v18  ;;  %v35_v30 = vld [vmem:[#allocation2 + $0x38] sm:$0xff] }
  0xcc   :  { %v203_v21 = vpop.f32.mrf.mxu0  ;;  %v207_v22 = vpop.f32.mrf.mxu1 }
  0xcd   :  { %v134_v25 = vadd.f32 %v203_v21, %v30_v19  ;;  %v138_v26 = vadd.f32 %v207_v22, %v34_v20 }
  0xce   :  { %v101_v27 = vpop.f32.mrf.mxu0  ;;  %v117_v28 = vpop.f32.mrf.mxu1 }
  0xcf   :  { %142 = vst.msk [vmem:[#allocation2 + $0x10] sm:$0xff] %vm19_vm0, %v134_v25  ;;  %146 = vst.msk [vmem:[#allocation2 + $0x30] sm:$0xff] %vm19_vm0, %v138_v26  ;;  %v132_v31 = vadd.f32 %v101_v27, %v28_v23  ;;  %v136_v32 = vadd.f32 %v117_v28, %v32_v24 }
  0xd0   :  { %v204_v33 = vpop.f32.mrf.mxu0  ;;  %v208_v34 = vpop.f32.mrf.mxu1 }
  0xd1   :  { %140 = vst.msk [vmem:[#allocation2] sm:$0xff] %vm19_vm0, %v132_v31  ;;  %144 = vst.msk [vmem:[#allocation2 + $0x20] sm:$0xff] %vm19_vm0, %v136_v32  ;;  %v135_v37 = vadd.f32 %v204_v33, %v31_v29  ;;  %v139_v38 = vadd.f32 %v208_v34, %v35_v30 }
  0xd2   :  { %v104_v39 = vpop.f32.mrf.mxu0  ;;  %v120_v40 = vpop.f32.mrf.mxu1 }
  0xd3   :  { %143 = vst.msk [vmem:[#allocation2 + $0x18] sm:$0xff] %vm19_vm0, %v135_v37  ;;  %147 = vst.msk [vmem:[#allocation2 + $0x38] sm:$0xff] %vm19_vm0, %v139_v38  ;;  %v133_v41 = vadd.f32 %v104_v39, %v29_v35  ;;  %v137_v42 = vadd.f32 %v120_v40, %v33_v36 }
  0xd5   :  { %141 = vst.msk [vmem:[#allocation2 + $0x8] sm:$0xff] %vm19_vm0, %v133_v41  ;;  %145 = vst.msk [vmem:[#allocation2 + $0x28] sm:$0xff] %vm19_vm0, %v137_v42 }
  0xd6   :  { %v153_v44 = vld [vmem:[#allocation2 + $0x10] sm:$0xff] }
  0xd7   :  { %v157_v45 = vld [vmem:[#allocation2 + $0x30] sm:$0xff]  ;;  %v168_v46 = vadd.f32 %v190_v43, %v153_v44 }
  0xd8   :  { %v172_v47 = vadd.f32 %v190_v43, %v157_v45  ;;  %v151_v48 = vld [vmem:[#allocation2] sm:$0xff] }
  0xd9   :  { %v155_v49 = vld [vmem:[#allocation2 + $0x20] sm:$0xff]  ;;  %176 = vst.msk [vmem:[%s329_s3 + $0x10] sm:$0xff] %vm19_vm0, %v168_v46  ;;  %v166_v50 = vadd.f32 %v190_v43, %v151_v48 }
  0xda   :  { %180 = vst.msk [vmem:[%s329_s3 + $0x30] sm:$0xff] %vm19_vm0, %v172_v47  ;;  %v170_v51 = vadd.f32 %v190_v43, %v155_v49  ;;  %v154_v52 = vld [vmem:[#allocation2 + $0x18] sm:$0xff] }
  0xdb   :  { %v158_v53 = vld [vmem:[#allocation2 + $0x38] sm:$0xff]  ;;  %174 = vst.msk [vmem:[%s329_s3] sm:$0xff] %vm19_vm0, %v166_v50  ;;  %v169_v54 = vadd.f32 %v190_v43, %v154_v52 }
  0xdc   :  { %178 = vst.msk [vmem:[%s329_s3 + $0x20] sm:$0xff] %vm19_vm0, %v170_v51  ;;  %v173_v55 = vadd.f32 %v190_v43, %v158_v53  ;;  %v152_v56 = vld [vmem:[#allocation2 + $0x8] sm:$0xff] }
  0xdd   :  { %v156_v57 = vld [vmem:[#allocation2 + $0x28] sm:$0xff]  ;;  %177 = vst.msk [vmem:[%s329_s3 + $0x18] sm:$0xff] %vm19_vm0, %v169_v54  ;;  %v167_v58 = vadd.f32 %v190_v43, %v152_v56 }
  0xde   :  { %181 = vst.msk [vmem:[%s329_s3 + $0x38] sm:$0xff] %vm19_vm0, %v173_v55  ;;  %v171_v59 = vadd.f32 %v190_v43, %v156_v57 }
  0xdf   :  { %175 = vst.msk [vmem:[%s329_s3 + $0x8] sm:$0xff] %vm19_vm0, %v167_v58 }
  0xe0   :  { %179 = vst.msk [vmem:[%s329_s3 + $0x28] sm:$0xff] %vm19_vm0, %v171_v59 }

</bundles_post_ra>
